<compile_context>
chip_gen: v5e
topology: v5e:2x2
jax: 0.10.0
libtpu: 0.0.40
codegen_flags: <defaults>
</compile_context>

<pallas_src>
import jax
import jax.numpy as jnp
from jax import lax
from jax.experimental import pallas as pl
from jax.experimental.pallas import tpu as pltpu


def _residual_block_kernel(x_ref, w1_ref, b1_ref, w2_ref, b2_ref, o_ref):
    # x_ref:  (TB, Fp) f32 input tile
    # w1_ref: (Fp, Fp) compute-dtype fc1 weight, (in, out) K-major layout
    # b1_ref: (1, Fp)  f32
    # w2_ref: (Fp, Fp) compute-dtype fc2 weight, (in, out) K-major layout
    # b2_ref: (1, Fp)  f32
    # o_ref:  (TB, Fp)
    cdt = w1_ref.dtype

    # fc1 (MXU, f32 accumulation) + bias + ReLU in f32.
    h = lax.dot_general(
        x_ref[...].astype(cdt), w1_ref[...],
        dimension_numbers=(((1,), (0,)), ((), ())),
        preferred_element_type=jnp.float32)
    h = jnp.maximum(h + b1_ref[...], 0.0)

    # fc2 (MXU, f32 accumulation).
    y = lax.dot_general(
        h.astype(cdt), w2_ref[...],
        dimension_numbers=(((1,), (0,)), ((), ())),
        preferred_element_type=jnp.float32)

    # Residual add: re-read x here (short live range -> no f32 tile held
    # across both MXU passes).
    o_ref[...] = (y + b2_ref[...] + x_ref[...]).astype(o_ref.dtype)


def _round_up(x, m):
    return (x + m - 1) // m * m


def _physical_vmem_bytes():
    try:
        v = getattr(pltpu.get_tpu_info(), "vmem_capacity_bytes", None)
        if v:
            return int(v)
    except Exception:
        pass
    return 64 << 20  # conservative default (v7x per-TensorCore VMEM)


def prepare_residual_block_params(w1, b1, w2, b2, compute_dtype=jnp.bfloat16):
    """Pad / transpose / cast weights once (hoisted out of the hot path).

    w1, w2: (F, F) in PyTorch (out, in) layout; b1, b2: (F,).
    Set compute_dtype=jnp.float32 for exact f32 matmuls (slower on MXU).
    """
    F = w1.shape[1]
    assert w1.shape == (F, F) and w2.shape == (F, F)
    assert b1.shape == (F,) and b2.shape == (F,)

    # Lane-dense padding only when F exceeds one vreg lane width; small F
    # uses full-array blocks instead (no (128/F)^2 inflation).
    Fp = F if F <= 128 else _round_up(F, 128)
    # TODO(synk): for very large F (bf16 weights alone near VMEM capacity,
    # ~4096+ on v7x) the weights should additionally be tiled along the
    # output-feature axis with a second grid dimension.

    def prep_w(w):
        wt = w.T  # (in, out) K-major: MXU-canonical rhs (K on sublanes)
        if Fp != F:
            wt = jnp.zeros((Fp, Fp), wt.dtype).at[:F, :F].set(wt)
        return wt.astype(compute_dtype)

    def prep_b(b):
        if Fp != F:
            b = jnp.zeros((Fp,), b.dtype).at[:F].set(b)
        return b.reshape(1, Fp).astype(jnp.float32)

    return (prep_w(w1), prep_b(b1), prep_w(w2), prep_b(b2), F, Fp)


def _pick_tile_b(B, Fp, weight_bytes, phys_vmem):
    bp8 = _round_up(max(B, 1), 8)
    # VMEM budget with headroom: resident weights/biases + per-row cost of
    # double-buffered f32 x/out tiles and the f32/bf16 intermediates.
    budget = int(phys_vmem * 0.7) - weight_bytes
    per_row_bytes = (2 * 4 + 2 * 4 + 3 * 4) * Fp
    cap = budget // max(per_row_bytes, 1)
    for t in (256, 128, 64, 32, 16, 8):
        if t > 8 and t > cap:
            continue                                  # over VMEM budget
        if bp8 >= 16 and t >= bp8:
            continue                                  # keep >= 2 grid steps
        if _round_up(bp8, t) > int(1.5 * bp8):
            continue                                  # too much zero-row padding
        return t
    return 8


def residual_block_apply(x, params):
    w1t, b1_2d, w2t, b2_2d, F, Fp = params
    B = x.shape[0]
    assert x.shape == (B, F)

    phys_vmem = _physical_vmem_bytes()
    w_itemsize = jnp.dtype(w1t.dtype).itemsize
    weight_bytes = 2 * Fp * Fp * w_itemsize + 2 * Fp * 4
    tile_b = _pick_tile_b(B, Fp, weight_bytes, phys_vmem)
    Bp = _round_up(max(B, 1), tile_b)
    grid = (Bp // tile_b,)

    if (Bp != B) or (Fp != F):
        x_p = jnp.zeros((Bp, Fp), x.dtype).at[:B, :F].set(x)
    else:
        x_p = x

    # Deeper input pipelining only when VMEM is plentiful (v5e/v6e 128 MiB)
    # and there are enough grid steps to hide DMA behind.
    x_buffers = 3 if (phys_vmem >= (100 << 20) and grid[0] >= 3) else 2

    # Generation-aware VMEM limit: ~2x the working set, clamped below the
    # physical capacity (64 MiB on v7x, 128 MiB on v5e/v6e).
    work = (weight_bytes
            + x_buffers * tile_b * Fp * 4     # x tiles
            + 2 * tile_b * Fp * 4             # out tiles (double-buffered)
            + 4 * tile_b * Fp * 4)            # intermediates headroom
    vmem_limit = int(min(max(2 * work, 16 << 20), int(phys_vmem * 0.9)))

    out = pl.pallas_call(
        _residual_block_kernel,
        out_shape=jax.ShapeDtypeStruct((Bp, Fp), x.dtype),
        grid_spec=pltpu.PrefetchScalarGridSpec(
            num_scalar_prefetch=0,
            grid=grid,
            in_specs=[
                # x tile: streamed, pipelined across batch tiles.
                pl.BlockSpec((tile_b, Fp), lambda i: (i, 0),
                             pipeline_mode=pl.Buffered(x_buffers)),
                # Weights / biases: constant block index -> fetched once,
                # resident in VMEM, single-buffered.
                pl.BlockSpec((Fp, Fp), lambda i: (0, 0),
                             pipeline_mode=pl.Buffered(1)),
                pl.BlockSpec((1, Fp), lambda i: (0, 0),
                             pipeline_mode=pl.Buffered(1)),
                pl.BlockSpec((Fp, Fp), lambda i: (0, 0),
                             pipeline_mode=pl.Buffered(1)),
                pl.BlockSpec((1, Fp), lambda i: (0, 0),
                             pipeline_mode=pl.Buffered(1)),
            ],
            out_specs=pl.BlockSpec((tile_b, Fp), lambda i: (i, 0)),
        ),
        compiler_params=pltpu.CompilerParams(
            dimension_semantics=("parallel",),
            vmem_limit_bytes=vmem_limit,
        ),
    )(x_p, w1t, b1_2d, w2t, b2_2d)

    if (Bp != B) or (Fp != F):
        out = out[:B, :F]
    return out


def residual_block(x, w1, b1, w2, b2, compute_dtype=jnp.bfloat16):
    """One-shot convenience wrapper.  For repeated calls with static weights,
    call prepare_residual_block_params once and reuse residual_block_apply."""
    return residual_block_apply(
        x, prepare_residual_block_params(w1, b1, w2, b2, compute_dtype))


def _ref_forward(x, w1, b1, w2, b2):
    # Pure-JAX f32 reference matching the PyTorch forward exactly.
    h = jnp.maximum(x @ w1.T + b1, 0.0)
    y = h @ w2.T + b2
    return y + x


if __name__ == "__main__":
    # Shapes consistent with the module: input_size == output_size == 8
    # (the residual add requires it), batch = 8.
    B, F = 8, 8
    key = jax.random.PRNGKey(0)
    kx, kw1, kb1, kw2, kb2 = jax.random.split(key, 5)

    bound = 1.0 / (F ** 0.5)  # PyTorch-like uniform init bounds
    x = jax.random.normal(kx, (B, F), dtype=jnp.float32)
    w1 = jax.random.uniform(kw1, (F, F), minval=-bound, maxval=bound, dtype=jnp.float32)
    b1 = jax.random.uniform(kb1, (F,), minval=-bound, maxval=bound, dtype=jnp.float32)
    w2 = jax.random.uniform(kw2, (F, F), minval=-bound, maxval=bound, dtype=jnp.float32)
    b2 = jax.random.uniform(kb2, (F,), minval=-bound, maxval=bound, dtype=jnp.float32)

    out = jax.block_until_ready(residual_block(x, w1, b1, w2, b2))
    ref = _ref_forward(x, w1, b1, w2, b2)

    assert out.shape == (B, F)
    # bf16 MXU matmuls with f32 accumulation -> loosened tolerance vs f32 ref
    # (pass compute_dtype=jnp.float32 for exact f32 results).
    assert jnp.allclose(out, ref, atol=2e-2, rtol=2e-2), "mismatch vs reference"

    print("KERNEL_OK")
</pallas_src>

<mosaic_0001>
module attributes {stable_mosaic.version = 11 : i64} {
  func.func @_residual_block_kernel(%arg0: i32, %arg1: memref<8x8xf32, #tpu.memory_space<vmem>>, %arg2: memref<8x8xbf16, #tpu.memory_space<vmem>>, %arg3: memref<1x8xf32, #tpu.memory_space<vmem>>, %arg4: memref<8x8xbf16, #tpu.memory_space<vmem>>, %arg5: memref<1x8xf32, #tpu.memory_space<vmem>>, %arg6: memref<8x8xf32, #tpu.memory_space<vmem>>) attributes {dimension_semantics = [#tpu.dimension_semantics<parallel>], iteration_bounds = array<i64: 1>, scalar_prefetch = 0 : i64, scratch_operands = 0 : i64, tpu.core_type = #tpu.core_type<tc>, window_params = [{pipeline_mode = #tpu.pipeline_mode<double_buffered>, transform_indices = @transform_0, window_bounds = array<i64: 8, 8>}, {pipeline_mode = #tpu.pipeline_mode<synchronous>, transform_indices = @transform_1, window_bounds = array<i64: 8, 8>}, {pipeline_mode = #tpu.pipeline_mode<synchronous>, transform_indices = @transform_2, window_bounds = array<i64: 1, 8>}, {pipeline_mode = #tpu.pipeline_mode<synchronous>, transform_indices = @transform_3, window_bounds = array<i64: 8, 8>}, {pipeline_mode = #tpu.pipeline_mode<synchronous>, transform_indices = @transform_4, window_bounds = array<i64: 1, 8>}, {transform_indices = @transform_5, window_bounds = array<i64: 8, 8>}]} {
    %c0 = arith.constant 0 : index
    %c0_0 = arith.constant 0 : index
    %0 = vector.load %arg1[%c0, %c0_0] : memref<8x8xf32, #tpu.memory_space<vmem>>, vector<8x8xf32>
    %1 = arith.truncf %0 : vector<8x8xf32> to vector<8x8xbf16>
    %c0_1 = arith.constant 0 : index
    %c0_2 = arith.constant 0 : index
    %2 = vector.load %arg2[%c0_1, %c0_2] : memref<8x8xbf16, #tpu.memory_space<vmem>>, vector<8x8xbf16>
    %cst = arith.constant dense<0.000000e+00> : vector<8x8xf32>
    %3 = tpu.matmul %1, %2, %cst {dimension_numbers = #tpu.dot_dimension_numbers<[1], [0], [0], [1], [0, 0, 1, 1], [], []>} : vector<8x8xbf16>, vector<8x8xbf16>, vector<8x8xf32> -> vector<8x8xf32>
    %c0_3 = arith.constant 0 : index
    %c0_4 = arith.constant 0 : index
    %4 = vector.load %arg3[%c0_3, %c0_4] : memref<1x8xf32, #tpu.memory_space<vmem>>, vector<1x8xf32>
    %5 = vector.broadcast %4 : vector<1x8xf32> to vector<8x8xf32>
    %6 = arith.addf %3, %5 : vector<8x8xf32>
    %cst_5 = arith.constant 0.000000e+00 : f32
    %7 = vector.broadcast %cst_5 : f32 to vector<8x8xf32>
    %8 = arith.maximumf %6, %7 : vector<8x8xf32>
    %9 = arith.truncf %8 : vector<8x8xf32> to vector<8x8xbf16>
    %c0_6 = arith.constant 0 : index
    %c0_7 = arith.constant 0 : index
    %10 = vector.load %arg4[%c0_6, %c0_7] : memref<8x8xbf16, #tpu.memory_space<vmem>>, vector<8x8xbf16>
    %cst_8 = arith.constant dense<0.000000e+00> : vector<8x8xf32>
    %11 = tpu.matmul %9, %10, %cst_8 {dimension_numbers = #tpu.dot_dimension_numbers<[1], [0], [0], [1], [0, 0, 1, 1], [], []>} : vector<8x8xbf16>, vector<8x8xbf16>, vector<8x8xf32> -> vector<8x8xf32>
    %c0_9 = arith.constant 0 : index
    %c0_10 = arith.constant 0 : index
    %12 = vector.load %arg5[%c0_9, %c0_10] : memref<1x8xf32, #tpu.memory_space<vmem>>, vector<1x8xf32>
    %13 = vector.broadcast %12 : vector<1x8xf32> to vector<8x8xf32>
    %14 = arith.addf %11, %13 : vector<8x8xf32>
    %c0_11 = arith.constant 0 : index
    %c0_12 = arith.constant 0 : index
    %15 = vector.load %arg1[%c0_11, %c0_12] : memref<8x8xf32, #tpu.memory_space<vmem>>, vector<8x8xf32>
    %16 = arith.addf %14, %15 : vector<8x8xf32>
    %c0_13 = arith.constant 0 : index
    %c0_14 = arith.constant 0 : index
    %17 = vector.load %arg6[%c0_13, %c0_14] : memref<8x8xf32, #tpu.memory_space<vmem>>, vector<8x8xf32>
    tpu.vector_store %arg6[%c0_13, %c0_14], %16 {strides = array<i32>} : memref<8x8xf32, #tpu.memory_space<vmem>>, vector<8x8xf32>,
    return
  }
  func.func @transform_0(%arg0: i32) -> (i32, i32) {
    %c0_i32 = arith.constant 0 : i32
    %c0_i32_0 = arith.constant 0 : i32
    return %arg0, %c0_i32 : i32, i32
  }
  func.func @transform_1(%arg0: i32) -> (i32, i32) {
    %c0_i32 = arith.constant 0 : i32
    %c0_i32_0 = arith.constant 0 : i32
    %c0_i32_1 = arith.constant 0 : i32
    return %c0_i32, %c0_i32_0 : i32, i32
  }
  func.func @transform_2(%arg0: i32) -> (i32, i32) {
    %c0_i32 = arith.constant 0 : i32
    %c0_i32_0 = arith.constant 0 : i32
    %c0_i32_1 = arith.constant 0 : i32
    return %c0_i32, %c0_i32_0 : i32, i32
  }
  func.func @transform_3(%arg0: i32) -> (i32, i32) {
    %c0_i32 = arith.constant 0 : i32
    %c0_i32_0 = arith.constant 0 : i32
    %c0_i32_1 = arith.constant 0 : i32
    return %c0_i32, %c0_i32_0 : i32, i32
  }
  func.func @transform_4(%arg0: i32) -> (i32, i32) {
    %c0_i32 = arith.constant 0 : i32
    %c0_i32_0 = arith.constant 0 : i32
    %c0_i32_1 = arith.constant 0 : i32
    return %c0_i32, %c0_i32_0 : i32, i32
  }
  func.func @transform_5(%arg0: i32) -> (i32, i32) {
    %c0_i32 = arith.constant 0 : i32
    %c0_i32_0 = arith.constant 0 : i32
    return %arg0, %c0_i32 : i32, i32
  }
}

</mosaic_0001>

<bundles_post_ra>
// kernel: tpu_custom_call.1
= control target key start
LH: loop header
LB: loop body
LE: loop exit
PB: predicated region body
PF: predicated region fallthrough
CT: control target
= control target key end

     0   :  { %10 = vsyncpa [#allocation3], 0  ;;  %s302_s0 = inlined_call_operand.hbm [shape: f32[8,8], index: 0, kind: input, shape index: {}]   ;;  %s303_s1 = inlined_call_operand.hbm [shape: bf16[8,8], index: 1, kind: input, shape index: {}]   ;;  %s304_s2 = inlined_call_operand.vmem [shape: f32[1,8], index: 2, kind: input, shape index: {}]   ;;  %s305_s3 = inlined_call_operand.hbm [shape: bf16[8,8], index: 3, kind: input, shape index: {}]   ;;  %s306_s4 = inlined_call_operand.vmem [shape: f32[1,8], index: 4, kind: input, shape index: {}]   ;;  %s307_s5 = inlined_call_operand.hbm [shape: f32[8,8], index: 5, kind: output, shape index: {}]  }
   0x1   :  { %11 = vsyncpa [#allocation6], 0  ;;  %s29_s20 = sshll.u32 %s303_s1, 4  ;;  %s30_s20 = int_to_ptr.hbm [resolvable:$true] %s29_s20 }
   0x2   :  { %12 = vsyncpa [#allocation4], 0  ;;  %s247_s21 = smov [#allocation5]   ;;  %s18_s25 = sshll.u32 %s302_s0, 4  ;;  %s19_s25 = int_to_ptr.hbm [resolvable:$true] %s18_s25 }
   0x3   :  { %s31_s22 = sshll.u32 %s247_s21, 4  ;;  %s248_s26 = smov [#allocation2]   ;;  %s32_s22 = int_to_ptr.vmem [resolvable:$true] %s31_s22 }
   0x4   :  { %34 = dma.hbm_to_vmem [thread:$0]  %s30_s20, 64, %s32_s22, [#allocation6]  }
   0x5   :  { %s20_s27 = sshll.u32 %s248_s26, 4  ;;  %s42_s30 = sshll.u32 %s305_s3, 4  ;;  %s21_s27 = int_to_ptr.vmem [resolvable:$true] %s20_s27  ;;  %s43_s30 = int_to_ptr.hbm [resolvable:$true] %s42_s30 }
   0x6   :  { %23 = dma.hbm_to_vmem [thread:$0]  %s19_s25, 128, %s21_s27, [#allocation3]  }
   0x7   :  { %s249_s1 = smov [#allocation7]  }
   0x8   :  { %s44_s6 = sshll.u32 %s249_s1, 4  ;;  %s45_s6 = int_to_ptr.vmem [resolvable:$true] %s44_s6 }
   0x9   :  { %47 = dma.hbm_to_vmem [thread:$0]  %s43_s30, 64, %s45_s6, [#allocation6]  }
   0xa   :  { %241 = dma.done.wait [#allocation3], 128  }
   0xb   :  { %242 = vsyncadd [#allocation3], 4294967168 }
   0xc   :  { %243 = dma.done.wait [#allocation6], 128  }
   0xd   :  { %244 = vsyncadd [#allocation6], 4294967168  ;;  %vm74_vm0 = vcmask 1043456   ;;  %v65_v0 = vld [vmem:[#allocation5] sm:$0xf]  ;;  %v63_v1 = vld [vmem:[#allocation2] sm:$0xff] }
   0xe   :  { %v76_v2 = vsel %vm74_vm0, %v65_v0, 0  ;;  %v64_v3 = vpack.c.bf16 %v63_v1, %v63_v1  ;;  %vm70_vm1 = vcmask 64512   ;;  %v93_v4 = vld [vmem:[#allocation7] sm:$0xf]  ;;  %v143_v6 = vld [vmem:[%s304_s2] ss:$0 sm:$0xff] }
   0xf   :  { %85 = vmatpush.bf16.msra.mxu0 %v76_v2  ;;  %v102_v5 = vsel %vm74_vm0, %v93_v4, 0  ;;  %v144_v12 = vld [vmem:[%s306_s4] ss:$0 sm:$0xff]  ;;  %s250_s9 = smov [#allocation8]   ;;  %s126_s13 = sshll.u32 %s307_s5, 4  ;;  %s127_s13 = int_to_ptr.hbm [resolvable:$true] %s126_s13 }
  0x10   :  { %111 = vmatpush.bf16.msra.mxu1 %v102_v5  ;;  %s124_s10 = sshll.u32 %s250_s9, 4  ;;  %s125_s10 = int_to_ptr.vmem [resolvable:$true] %s124_s10 }
  0x12   :  { %137 = vmatmul.msk.bf16.vlgmr.msra.gmra.mxu0 %vm70_vm1, %v64_v3 }
  0x8f   :  { %v87_v7 = vpop.f32.mrf.mxu0 }
  0x90   :  { %v88_v8 = vadd.f32 %v143_v6, %v87_v7 }
  0x92   :  { %v91_v9 = vmax.f32 %v88_v8, 0.0 }
  0x94   :  { %v92_v10 = vpack.c.bf16 %v91_v9, %v91_v9 }
  0x96   :  { %138 = vmatmul.msk.bf16.vlgmr.msra.gmra.mxu1 %vm70_vm1, %v92_v10 }
  0x97   :  { %v89_v11 = vpop.f32.mrf.mxu0 }
 0x113   :  { %v113_v13 = vpop.f32.mrf.mxu1 }
 0x114   :  { %v114_v14 = vadd.f32 %v144_v12, %v113_v13 }
 0x116   :  { %v117_v15 = vadd.f32 %v114_v14, %v63_v1 }
 0x118   :  { %118 = vst.msk [vmem:[#allocation8] sm:$0xff] %vm70_vm1, %v117_v15 }
 0x119   :  { %129 = dma.vmem_to_hbm [thread:$0]  %s125_s10, 128, %s127_s13, [#allocation4]  }
 0x11b   :  { %v115_v16 = vpop.f32.mrf.mxu1 }
 0x11c   :  { %245 = dma.done.wait [#allocation4], 128  }
 0x11d   :  { %246 = vsyncadd [#allocation4], 4294967168 }
 0x11e   :  { %134 = vsyncpa [#allocation3], 1 }
 0x11f   :  { %135 = vsyncpa [#allocation6], 1 }
 0x120   :  { %136 = vsyncpa [#allocation4], 1 }

</bundles_post_ra>
